<compile_context>
chip_gen: v5e
topology: v5e:2x2
jax: 0.10.0
libtpu: 0.0.40
codegen_flags: <defaults>
</compile_context>

<pallas_src>
import functools
import math

import jax
import jax.numpy as jnp
from jax import lax
from jax.experimental import pallas as pl
from jax.experimental.pallas import tpu as pltpu

IN_DIM = 10
HID_DIM = 20
OUT_DIM = 10

# Rows of the flattened batch processed per grid step (see header comment for
# the VMEM math that caps this at ~8192 with row-major blocks).
DEFAULT_TILE_N = 8192
_MIN_SPLIT_N = 4096            # below this, one exact block covers the batch
_VMEM_ROW_BYTES = 128 * 4      # one lane-padded f32 row of a (*, <=128) block


def _round_up(v: int, m: int) -> int:
    return ((v + m - 1) // m) * m


def _pick_tile(n: int, target: int) -> int:
    """Rows per grid step.

    Small batches: a single block whose dim equals the full array dim (always
    layout-legal, no boundary handling).  Larger batches: ~n/4 rounded up to a
    multiple of 8 (so v7x's two TensorCores both get work), capped at target.
    """
    if n <= _MIN_SPLIT_N:
        return n
    return min(target, _round_up(pl.cdiv(n, 4), 8))


def _mlp_kernel(x_ref, w1_ref, b1_ref, w2_ref, b2_ref, o_ref, *, precision):
    # x_ref: (tile_n, IN_DIM) row-major block of the flattened batch.
    x = x_ref[...]
    # fc1 + ReLU: (tile_n, 10) @ (10, 20) -> (tile_n, 20)
    h = jnp.dot(x, w1_ref[...], precision=precision,
                preferred_element_type=jnp.float32)
    h = jnp.maximum(h + b1_ref[...], 0.0)
    # fc2: (tile_n, 20) @ (20, 10) -> (tile_n, 10)
    y = jnp.dot(h, w2_ref[...], precision=precision,
                preferred_element_type=jnp.float32)
    o_ref[...] = (y + b2_ref[...]).astype(o_ref.dtype)


@functools.partial(jax.jit, static_argnames=("tile_n", "precision"))
def dummy_model_forward(x, w1, b1, w2, b2, *, tile_n: int = DEFAULT_TILE_N,
                        precision=lax.Precision.DEFAULT):
    """Pallas equivalent of DummyModel.forward.

    x : any shape whose flattened size is divisible by 10 (x.view(-1, 10)).
    w1: (20, 10), b1: (20,), w2: (10, 20), b2: (10,)  -- PyTorch nn.Linear layout.
    Returns (N, 10) float32 with N = x.size // 10.
    """
    x2d = x.reshape(-1, IN_DIM)          # free view, no HBM copy
    if x2d.dtype != jnp.float32:
        x2d = x2d.astype(jnp.float32)
    n = x2d.shape[0]

    # Tiny one-time parameter re-layout (a few hundred floats, negligible).
    w1t = w1.astype(jnp.float32).T.reshape(IN_DIM, HID_DIM)
    w2t = w2.astype(jnp.float32).T.reshape(HID_DIM, OUT_DIM)
    b1r = b1.astype(jnp.float32).reshape(1, HID_DIM)
    b2r = b2.astype(jnp.float32).reshape(1, OUT_DIM)

    tn = _pick_tile(n, tile_n)
    grid = (pl.cdiv(n, tn),)   # boundary block (if any) is clipped by Pallas

    # VMEM budget: 2x double-buffered x blocks + 2x out blocks + ~2 lane-padded
    # intermediates, each tn * 512 bytes, plus headroom.  Kept under 60 MiB so
    # it is always below v7x's 64 MiB physical VMEM per TensorCore.
    vmem_limit = max(16 << 20, min(8 * tn * _VMEM_ROW_BYTES + (4 << 20), 60 << 20))

    flops = (2 * IN_DIM * HID_DIM + 2 * HID_DIM * OUT_DIM + 2 * HID_DIM + OUT_DIM) * n
    bytes_accessed = 4 * (n * (IN_DIM + OUT_DIM)
                          + IN_DIM * HID_DIM + HID_DIM * OUT_DIM + HID_DIM + OUT_DIM)

    kernel = functools.partial(_mlp_kernel, precision=precision)
    return pl.pallas_call(
        kernel,
        out_shape=jax.ShapeDtypeStruct((n, OUT_DIM), jnp.float32),
        grid_spec=pltpu.PrefetchScalarGridSpec(
            num_scalar_prefetch=0,
            grid=grid,
            in_specs=[
                pl.BlockSpec((tn, IN_DIM), lambda i: (i, 0)),        # x tile (streamed)
                pl.BlockSpec((IN_DIM, HID_DIM), lambda i: (0, 0)),   # w1.T  (resident)
                pl.BlockSpec((1, HID_DIM), lambda i: (0, 0)),        # b1    (resident)
                pl.BlockSpec((HID_DIM, OUT_DIM), lambda i: (0, 0)),  # w2.T  (resident)
                pl.BlockSpec((1, OUT_DIM), lambda i: (0, 0)),        # b2    (resident)
            ],
            out_specs=pl.BlockSpec((tn, OUT_DIM), lambda i: (i, 0)),
        ),
        compiler_params=pltpu.CompilerParams(
            dimension_semantics=("parallel",),   # v7x: split batch tiles over 2 TCs
            vmem_limit_bytes=vmem_limit,
        ),
        cost_estimate=pl.CostEstimate(
            flops=flops, transcendentals=0, bytes_accessed=bytes_accessed),
    )(x2d, w1t, b1r, w2t, b2r)


def init_params(key):
    """Deterministic init mimicking torch.nn.Linear (uniform(-1/sqrt(fan_in), +)),
    stored in PyTorch layout: weight (out, in), bias (out,)."""
    k1, k2, k3, k4 = jax.random.split(key, 4)
    bound1 = 1.0 / math.sqrt(IN_DIM)
    bound2 = 1.0 / math.sqrt(HID_DIM)
    w1 = jax.random.uniform(k1, (HID_DIM, IN_DIM), jnp.float32, -bound1, bound1)
    b1 = jax.random.uniform(k2, (HID_DIM,), jnp.float32, -bound1, bound1)
    w2 = jax.random.uniform(k3, (OUT_DIM, HID_DIM), jnp.float32, -bound2, bound2)
    b2 = jax.random.uniform(k4, (OUT_DIM,), jnp.float32, -bound2, bound2)
    return w1, b1, w2, b2


# TODO(synk): PrivacyEngine / @remote_module wrappers (per-sample gradient /
# privacy bookkeeping) are training-time machinery with no forward-pass math;
# not represented in the kernel.

if __name__ == "__main__":
    key = jax.random.PRNGKey(0)
    pkey, xkey = jax.random.split(key)
    w1, b1, w2, b2 = init_params(pkey)

    # Small example consistent with forward's x.view(-1, 10): (2, 4, 10) -> 8 rows.
    x = jax.random.normal(xkey, (2, 4, IN_DIM), jnp.float32)

    # HIGHEST precision in the demo so the MXU result matches an exact-f32
    # reference (review correctness note); production calls keep the faster
    # default precision.
    out = dummy_model_forward(x, w1, b1, w2, b2, precision=lax.Precision.HIGHEST)
    out = jax.block_until_ready(out)

    # Pure-JAX reference of the same forward pass (PyTorch Linear semantics).
    x2 = x.reshape(-1, IN_DIM)
    h_ref = jnp.maximum(jnp.dot(x2, w1.T, precision=lax.Precision.HIGHEST) + b1, 0.0)
    ref = jnp.dot(h_ref, w2.T, precision=lax.Precision.HIGHEST) + b2

    assert out.shape == (x2.shape[0], OUT_DIM)
    assert jnp.allclose(out, ref, atol=1e-4, rtol=1e-4)

    print("KERNEL_OK")
</pallas_src>

<mosaic_0001>
module attributes {stable_mosaic.version = 11 : i64} {
  func.func @_mlp_kernel(%arg0: i32, %arg1: memref<8x10xf32, #tpu.memory_space<vmem>>, %arg2: memref<10x20xf32, #tpu.memory_space<vmem>>, %arg3: memref<1x20xf32, #tpu.memory_space<vmem>>, %arg4: memref<20x10xf32, #tpu.memory_space<vmem>>, %arg5: memref<1x10xf32, #tpu.memory_space<vmem>>, %arg6: memref<8x10xf32, #tpu.memory_space<vmem>>) attributes {dimension_semantics = [#tpu.dimension_semantics<parallel>], iteration_bounds = array<i64: 1>, scalar_prefetch = 0 : i64, scratch_operands = 0 : i64, tpu.core_type = #tpu.core_type<tc>, window_params = [{transform_indices = @transform_0, window_bounds = array<i64: 8, 10>}, {pipeline_mode = #tpu.pipeline_mode<synchronous>, transform_indices = @transform_1, window_bounds = array<i64: 10, 20>}, {pipeline_mode = #tpu.pipeline_mode<synchronous>, transform_indices = @transform_2, window_bounds = array<i64: 1, 20>}, {pipeline_mode = #tpu.pipeline_mode<synchronous>, transform_indices = @transform_3, window_bounds = array<i64: 20, 10>}, {pipeline_mode = #tpu.pipeline_mode<synchronous>, transform_indices = @transform_4, window_bounds = array<i64: 1, 10>}, {transform_indices = @transform_5, window_bounds = array<i64: 8, 10>}]} {
    %c0 = arith.constant 0 : index
    %c0_0 = arith.constant 0 : index
    %0 = vector.load %arg1[%c0, %c0_0] : memref<8x10xf32, #tpu.memory_space<vmem>>, vector<8x10xf32>
    %c0_1 = arith.constant 0 : index
    %c0_2 = arith.constant 0 : index
    %1 = vector.load %arg2[%c0_1, %c0_2] : memref<10x20xf32, #tpu.memory_space<vmem>>, vector<10x20xf32>
    %cst = arith.constant dense<0.000000e+00> : vector<8x20xf32>
    %2 = tpu.matmul %0, %1, %cst {dimension_numbers = #tpu.dot_dimension_numbers<[1], [0], [0], [1], [0, 0, 1, 1], [], []>, precision = #tpu.contract_precision<fp32>} : vector<8x10xf32>, vector<10x20xf32>, vector<8x20xf32> -> vector<8x20xf32>
    %c0_3 = arith.constant 0 : index
    %c0_4 = arith.constant 0 : index
    %3 = vector.load %arg3[%c0_3, %c0_4] : memref<1x20xf32, #tpu.memory_space<vmem>>, vector<1x20xf32>
    %4 = vector.broadcast %3 : vector<1x20xf32> to vector<8x20xf32>
    %5 = arith.addf %2, %4 : vector<8x20xf32>
    %cst_5 = arith.constant 0.000000e+00 : f32
    %6 = vector.broadcast %cst_5 : f32 to vector<8x20xf32>
    %7 = arith.maximumf %5, %6 : vector<8x20xf32>
    %c0_6 = arith.constant 0 : index
    %c0_7 = arith.constant 0 : index
    %8 = vector.load %arg4[%c0_6, %c0_7] : memref<20x10xf32, #tpu.memory_space<vmem>>, vector<20x10xf32>
    %cst_8 = arith.constant dense<0.000000e+00> : vector<8x10xf32>
    %9 = tpu.matmul %7, %8, %cst_8 {dimension_numbers = #tpu.dot_dimension_numbers<[1], [0], [0], [1], [0, 0, 1, 1], [], []>, precision = #tpu.contract_precision<fp32>} : vector<8x20xf32>, vector<20x10xf32>, vector<8x10xf32> -> vector<8x10xf32>
    %c0_9 = arith.constant 0 : index
    %c0_10 = arith.constant 0 : index
    %10 = vector.load %arg5[%c0_9, %c0_10] : memref<1x10xf32, #tpu.memory_space<vmem>>, vector<1x10xf32>
    %11 = vector.broadcast %10 : vector<1x10xf32> to vector<8x10xf32>
    %12 = arith.addf %9, %11 : vector<8x10xf32>
    %c0_11 = arith.constant 0 : index
    %c0_12 = arith.constant 0 : index
    %13 = vector.load %arg6[%c0_11, %c0_12] : memref<8x10xf32, #tpu.memory_space<vmem>>, vector<8x10xf32>
    tpu.vector_store %arg6[%c0_11, %c0_12], %12 {strides = array<i32>} : memref<8x10xf32, #tpu.memory_space<vmem>>, vector<8x10xf32>,
    return
  }
  func.func @transform_0(%arg0: i32) -> (i32, i32) {
    %c0_i32 = arith.constant 0 : i32
    %c0_i32_0 = arith.constant 0 : i32
    return %arg0, %c0_i32 : i32, i32
  }
  func.func @transform_1(%arg0: i32) -> (i32, i32) {
    %c0_i32 = arith.constant 0 : i32
    %c0_i32_0 = arith.constant 0 : i32
    %c0_i32_1 = arith.constant 0 : i32
    return %c0_i32, %c0_i32_0 : i32, i32
  }
  func.func @transform_2(%arg0: i32) -> (i32, i32) {
    %c0_i32 = arith.constant 0 : i32
    %c0_i32_0 = arith.constant 0 : i32
    %c0_i32_1 = arith.constant 0 : i32
    return %c0_i32, %c0_i32_0 : i32, i32
  }
  func.func @transform_3(%arg0: i32) -> (i32, i32) {
    %c0_i32 = arith.constant 0 : i32
    %c0_i32_0 = arith.constant 0 : i32
    %c0_i32_1 = arith.constant 0 : i32
    return %c0_i32, %c0_i32_0 : i32, i32
  }
  func.func @transform_4(%arg0: i32) -> (i32, i32) {
    %c0_i32 = arith.constant 0 : i32
    %c0_i32_0 = arith.constant 0 : i32
    %c0_i32_1 = arith.constant 0 : i32
    return %c0_i32, %c0_i32_0 : i32, i32
  }
  func.func @transform_5(%arg0: i32) -> (i32, i32) {
    %c0_i32 = arith.constant 0 : i32
    %c0_i32_0 = arith.constant 0 : i32
    return %arg0, %c0_i32 : i32, i32
  }
}

</mosaic_0001>

<bundles_post_ra>
// kernel: dummy_model_forward.1
= control target key start
LH: loop header
LB: loop body
LE: loop exit
PB: predicated region body
PF: predicated region fallthrough
CT: control target
= control target key end

     0   :  { %vm32_vm0 = vcmask 1041408   ;;  %vm28_vm1 = vcmask 80896   ;;  %s489_s0 = inlined_call_operand.vmem [shape: f32[8,10], index: 0, kind: input, shape index: {}]   ;;  %s490_s1 = inlined_call_operand.vmem [shape: f32[10,20], index: 1, kind: input, shape index: {}]   ;;  %s491_s2 = inlined_call_operand.vmem [shape: f32[1,20], index: 2, kind: input, shape index: {}]   ;;  %s492_s3 = inlined_call_operand.vmem [shape: f32[20,10], index: 3, kind: input, shape index: {}]   ;;  %s493_s4 = inlined_call_operand.vmem [shape: f32[1,10], index: 4, kind: input, shape index: {}]   ;;  %s494_s5 = inlined_call_operand.hbm [shape: f32[8,10], index: 5, kind: output, shape index: {}]  }
   0x1   :  { %v23_v0 = vld [vmem:[%s490_s1 + $0x8] sm:$0x3]  ;;  %v22_v1 = vld [vmem:[%s490_s1] sm:$0xff] }
   0x2   :  { %v21_v2 = vld [vmem:[%s489_s0] sm:$0xff]  ;;  %v34_v3 = vsel %vm32_vm0, %v23_v0, 0  ;;  %v52_v4 = vand.u32 4294901760, %v22_v1 }
   0x3   :  { %v30_v5 = vsel %vm28_vm1, %v21_v2, 0  ;;  %v50_v6 = vand.u32 4294901760, %v34_v3 }
   0x4   :  { %v54_v7 = vand.u32 4294901760, %v30_v5  ;;  %v84_v8 = vsub.f32 %v22_v1, %v52_v4 }
   0x5   :  { %10 = vsyncpa [#allocation3], 0  ;;  %v78_v9 = vsub.f32 %v34_v3, %v50_v6  ;;  %51 = vmatpush.msra.mxu0 %v50_v6  ;;  %135 = vmatpush.msra.mxu3 %v50_v6  ;;  %v198_v20 = vld [vmem:[%s492_s3 + $0x10] sm:$0xf]  ;;  %vm207_vm2 = vcmask 1043456   ;;  %v197_v23 = vld [vmem:[%s492_s3 + $0x8] sm:$0xff] }
   0x6   :  { %v55_v10 = vsub.f32 %v30_v5, %v54_v7  ;;  %v85_v11 = vand.u32 4294901760, %v84_v8  ;;  %v209_v21 = vsel %vm207_vm2, %v198_v20, 0  ;;  %v226_v25 = vand.u32 4294901760, %v197_v23  ;;  %v196_v26 = vld [vmem:[%s492_s3] sm:$0xff]  ;;  %s429_s30 = smov [#allocation2]   ;;  %s391_s9 = sshll.u32 %s494_s5, 4  ;;  %s392_s9 = int_to_ptr.hbm [resolvable:$true] %s391_s9 }
   0x7   :  { %110 = vmatpush.msra.mxu2 %v78_v9  ;;  %53 = vmatpush.msra.mxu0 %v52_v4  ;;  %v79_v12 = vand.u32 4294901760, %v78_v9  ;;  %v224_v22 = vand.u32 4294901760, %v209_v21  ;;  %v228_v29 = vand.u32 4294901760, %v196_v26  ;;  %v401_v39 = vld [vmem:[%s491_s2] ss:$0 sm:$0xff]  ;;  %vm203_vm3 = vcmask 162816  }
   0x8   :  { %v56_v13 = vand.u32 4294901760, %v55_v10  ;;  %137 = vmatpush.msra.mxu3 %v52_v4  ;;  %v86_v14 = vsub.f32 %v84_v8, %v85_v11  ;;  %v259_v28 = vsub.f32 %v197_v23, %v226_v25  ;;  %v402_v59 = vld [vmem:[%s493_s4] ss:$0 sm:$0xff]  ;;  %s389_s6 = sshll.u32 %s429_s30, 4  ;;  %s390_s6 = int_to_ptr.vmem [resolvable:$true] %s389_s6 }
   0x9   :  { %113 = vmatpush.msra.mxu2 %v84_v8  ;;  %v80_v15 = vsub.f32 %v78_v9, %v79_v12  ;;  %162 = vmatpush.msrb.mxu0 %v79_v12  ;;  %v253_v24 = vsub.f32 %v209_v21, %v224_v22  ;;  %v265_v32 = vsub.f32 %v196_v26, %v228_v29 }
   0xa   :  { %v57_v16 = vsub.f32 %v55_v10, %v56_v13  ;;  %141 = vmatmul.f32.vlgmr.msra.gmra.mxu3 %v56_v13  ;;  %116 = vmatmul.f32.vlgmr.msra.gmra.mxu2 %v55_v10  ;;  %v87_v19 = vand.u32 4294901760, %v86_v14  ;;  %v260_v31 = vand.u32 4294901760, %v259_v28 }
   0xb   :  { %v81_v17 = vand.u32 4294901760, %v80_v15  ;;  %166 = vmatpush.msrb.mxu0 %v85_v11  ;;  %225 = vmatpush.msrb.mxu2 %v224_v22  ;;  %v254_v27 = vand.u32 4294901760, %v253_v24  ;;  %v266_v35 = vand.u32 4294901760, %v265_v32 }
   0xc   :  { %v58_v18 = vand.u32 4294901760, %v57_v16  ;;  %v261_v34 = vsub.f32 %v259_v28, %v260_v31 }
   0xd   :  { %82 = vmatpush.msra.mxu1 %v81_v17  ;;  %227 = vmatpush.msrb.mxu2 %v226_v25  ;;  %v255_v30 = vsub.f32 %v253_v24, %v254_v27  ;;  %v267_v37 = vsub.f32 %v265_v32, %v266_v35 }
   0xe   :  { %59 = vmatmul.f32.vlgmr.msra.gmra.mxu0 %v58_v18  ;;  %v262_v36 = vand.u32 4294901760, %v261_v34 }
   0xf   :  { %88 = vmatpush.msra.mxu1 %v87_v19  ;;  %290 = vmatpush.msra.mxu0 %v253_v24  ;;  %v256_v33 = vand.u32 4294901760, %v255_v30  ;;  %v268_v38 = vand.u32 4294901760, %v267_v37 }
  0x10   :  { %90 = vmatmul.f32.vlgmr.msra.gmra.mxu1 %v54_v7  ;;  %229 = vmatpush.msrb.mxu2 %v228_v29 }
  0x11   :  { %187 = vmatpush.msrb.mxu1 %v50_v6  ;;  %293 = vmatpush.msra.mxu0 %v259_v28 }
  0x12   :  { %345 = vmatpush.msra.mxu2 %v254_v27  ;;  %257 = vmatpush.msrb.mxu3 %v256_v33 }
  0x13   :  { %189 = vmatpush.msrb.mxu1 %v52_v4  ;;  %296 = vmatpush.msra.mxu0 %v265_v32 }
  0x14   :  { %349 = vmatpush.msra.mxu2 %v260_v31  ;;  %263 = vmatpush.msrb.mxu3 %v262_v36 }
  0x15   :  { %317 = vmatpush.msra.mxu1 %v224_v22 }
  0x16   :  { %168 = vmatmul.f32.vlgmr.msrb.gmra.mxu0 %v54_v7  ;;  %353 = vmatpush.msra.mxu2 %v266_v35 }
  0x17   :  { %319 = vmatpush.msra.mxu1 %v226_v25  ;;  %269 = vmatpush.msrb.mxu3 %v268_v38 }
  0x18   :  { %191 = vmatmul.f32.vlgmr.msrb.gmra.mxu1 %v54_v7 }
  0x19   :  { %321 = vmatpush.msra.mxu1 %v228_v29  ;;  %373 = vmatpush.msra.mxu3 %v224_v22 }
  0x1b   :  { %375 = vmatpush.msra.mxu3 %v226_v25 }
  0x1d   :  { %377 = vmatpush.msra.mxu3 %v228_v29 }
  0x8b   :  { %v60_v40 = vpop.f32.mrf.mxu0 }
  0x8c   :  { %v61_v41 = vadd.f32 %v401_v39, %v60_v40 }
  0x8d   :  { %v91_v42 = vpop.f32.mrf.mxu1  ;;  %v117_v43 = vpop.f32.mrf.mxu2 }
  0x8e   :  { %v92_v44 = vadd.f32 %v91_v42, %v61_v41  ;;  %v142_v45 = vpop.f32.mrf.mxu3 }
  0x90   :  { %v118_v46 = vadd.f32 %v117_v43, %v92_v44 }
  0x92   :  { %v143_v47 = vadd.f32 %v142_v45, %v118_v46 }
  0x93   :  { %v169_v48 = vpop.f32.mrf.mxu0 }
  0x94   :  { %v170_v49 = vadd.f32 %v169_v48, %v143_v47 }
  0x95   :  { %v192_v50 = vpop.f32.mrf.mxu1 }
  0x96   :  { %v193_v51 = vadd.f32 %v192_v50, %v170_v49 }
  0x98   :  { %v195_v52 = vmax.f32 %v193_v51, 0.0 }
  0x9a   :  { %v205_v53 = vsel %vm203_vm3, %v195_v52, 0 }
  0x9b   :  { %v230_v54 = vand.u32 4294901760, %v205_v53 }
  0x9d   :  { %v231_v55 = vsub.f32 %v205_v53, %v230_v54  ;;  %271 = vmatmul.f32.vlgmr.msrb.gmra.mxu3 %v230_v54 }
  0x9f   :  { %299 = vmatmul.f32.vlgmr.msra.gmra.mxu0 %v231_v55  ;;  %v232_v56 = vand.u32 4294901760, %v231_v55 }
  0xa1   :  { %325 = vmatmul.f32.vlgmr.msra.gmra.mxu1 %v232_v56  ;;  %v233_v57 = vsub.f32 %v231_v55, %v232_v56 }
  0xa3   :  { %v234_v58 = vand.u32 4294901760, %v233_v57 }
  0xa5   :  { %235 = vmatmul.f32.vlgmr.msrb.gmra.mxu2 %v234_v58  ;;  %379 = vmatmul.f32.vlgmr.msra.gmra.mxu3 %v230_v54 }
  0xad   :  { %355 = vmatmul.f32.vlgmr.msra.gmra.mxu2 %v230_v54 }
 0x11c   :  { %v300_v0 = vpop.f32.mrf.mxu0 }
 0x11e   :  { %v326_v2 = vpop.f32.mrf.mxu1 }
 0x120   :  { %v272_v60 = vpop.f32.mrf.mxu3 }
 0x128   :  { %v236_v61 = vpop.f32.mrf.mxu2  ;;  %v380_v6 = vpop.f32.mrf.mxu3 }
 0x129   :  { %v237_v62 = vadd.f32 %v402_v59, %v236_v61 }
 0x12b   :  { %v273_v63 = vadd.f32 %v272_v60, %v237_v62 }
 0x12d   :  { %v301_v1 = vadd.f32 %v300_v0, %v273_v63 }
 0x12f   :  { %v327_v3 = vadd.f32 %v326_v2, %v301_v1 }
 0x130   :  { %v356_v4 = vpop.f32.mrf.mxu2 }
 0x131   :  { %v357_v5 = vadd.f32 %v356_v4, %v327_v3 }
 0x133   :  { %v381_v7 = vadd.f32 %v380_v6, %v357_v5 }
 0x135   :  { %383 = vst.msk [vmem:[#allocation2] sm:$0xff] %vm28_vm1, %v381_v7 }
 0x136   :  { %394 = dma.vmem_to_hbm [thread:$0]  %s390_s6, 128, %s392_s9, [#allocation3]  }
 0x137   :  { %427 = dma.done.wait [#allocation3], 128  }
 0x138   :  { %428 = vsyncadd [#allocation3], 4294967168 }
 0x139   :  { %399 = vsyncpa [#allocation3], 1 }

</bundles_post_ra>
